<compile_context>
chip_gen: v5e
topology: v5e:2x2
jax: 0.10.0
libtpu: 0.0.40
codegen_flags: <defaults>
</compile_context>

<pallas_src>
import math

import jax
import jax.numpy as jnp
from jax.experimental import pallas as pl
from jax.experimental.pallas import tpu as pltpu


def _round_up(x, m):
    return ((x + m - 1) // m) * m


# -----------------------------------------------------------------------------
# Kernel 1: gate  W[k, n] = tanh(W_hat_T[k, n]) * sigmoid(M_hat_T[k, n])
# Computed once (hoisted) so the EUP transcendentals are not re-issued per
# batch tile; output emitted directly in the MXU input dtype.
# -----------------------------------------------------------------------------
def _nac_gate_kernel(w_hat_ref, m_hat_ref, w_ref):
    w = jnp.tanh(w_hat_ref[...]) * jax.nn.sigmoid(m_hat_ref[...])
    w_ref[...] = w.astype(w_ref.dtype)


def _nac_gate(w_hat_t, m_hat_t, *, tk, tn, compute_dtype):
    kp, np_ = w_hat_t.shape
    grid = (kp // tk, np_ // tn)
    spec = pl.BlockSpec((tk, tn), lambda i, j: (i, j))
    out_item = jnp.dtype(compute_dtype).itemsize
    return pl.pallas_call(
        _nac_gate_kernel,
        out_shape=jax.ShapeDtypeStruct((kp, np_), compute_dtype),
        grid_spec=pltpu.PrefetchScalarGridSpec(
            num_scalar_prefetch=0,
            grid=grid,
            in_specs=[spec, spec],
            out_specs=spec,
        ),
        compiler_params=pltpu.CompilerParams(
            dimension_semantics=("parallel", "parallel"),
            vmem_limit_bytes=32 * 1024 * 1024,
        ),
        cost_estimate=pl.CostEstimate(
            flops=kp * np_,
            transcendentals=3 * kp * np_,
            bytes_accessed=2 * kp * np_ * 4 + kp * np_ * out_item,
        ),
    )(w_hat_t, m_hat_t)


# -----------------------------------------------------------------------------
# Kernel 2: tiled MXU matmul  y[m, n] = sum_k x[m, k] * w[k, n]
# -----------------------------------------------------------------------------
def _nac_matmul_kernel(x_ref, w_ref, o_ref, acc_ref):
    @pl.when(pl.program_id(2) == 0)
    def _():
        acc_ref[...] = jnp.zeros_like(acc_ref)

    acc_ref[...] += jnp.dot(
        x_ref[...], w_ref[...], preferred_element_type=jnp.float32
    )

    @pl.when(pl.program_id(2) == pl.num_programs(2) - 1)
    def _():
        o_ref[...] = acc_ref[...].astype(o_ref.dtype)


def _nac_matmul(x_p, w_p, *, tm, tk, tn, out_dtype):
    mp, kp = x_p.shape
    kp2, np_ = w_p.shape
    assert kp == kp2
    grid = (mp // tm, np_ // tn, kp // tk)
    in_item = jnp.dtype(x_p.dtype).itemsize
    out_item = jnp.dtype(out_dtype).itemsize
    return pl.pallas_call(
        _nac_matmul_kernel,
        out_shape=jax.ShapeDtypeStruct((mp, np_), out_dtype),
        grid_spec=pltpu.PrefetchScalarGridSpec(
            num_scalar_prefetch=0,
            grid=grid,
            in_specs=[
                pl.BlockSpec((tm, tk), lambda i, j, k: (i, k)),
                pl.BlockSpec((tk, tn), lambda i, j, k: (k, j)),
            ],
            out_specs=pl.BlockSpec((tm, tn), lambda i, j, k: (i, j)),
            scratch_shapes=[pltpu.VMEM((tm, tn), jnp.float32)],
        ),
        compiler_params=pltpu.CompilerParams(
            # batch / out_dim tiles are independent -> "parallel" (v7x: 2 TCs);
            # K is a reduction into the VMEM accumulator -> "arbitrary", last.
            dimension_semantics=("parallel", "parallel", "arbitrary"),
            # Explicit VMEM budget: double-buffered x, w, out tiles + acc is
            # ~1-2 MiB, safely under v7x's 64 MiB physical VMEM.
            vmem_limit_bytes=32 * 1024 * 1024,
        ),
        cost_estimate=pl.CostEstimate(
            flops=2 * mp * np_ * kp,
            transcendentals=0,
            bytes_accessed=mp * kp * in_item + kp * np_ * in_item
            + mp * np_ * out_item,
        ),
    )(x_p, w_p)


def nac_forward(x, w_hat, m_hat, *, compute_dtype=jnp.bfloat16):
    """NAC forward: y = x @ (tanh(W_hat) * sigmoid(M_hat)).T  (no bias)."""
    batch, in_dim = x.shape
    out_dim, in_dim_w = w_hat.shape
    assert in_dim == in_dim_w and m_hat.shape == w_hat.shape
    out_dtype = x.dtype

    # Tile sizes (all (8,128)-aligned).
    tm = min(128, _round_up(batch, 8))
    tk = min(512, _round_up(in_dim, 128))
    tn = min(256, _round_up(out_dim, 128))

    mp = _round_up(batch, tm)
    kp = _round_up(in_dim, tk)
    np_ = _round_up(out_dim, tn)

    # Wrapper-side layout plumbing: transpose the weights to (K, N) so the
    # kernels never transpose, and zero-pad everything to tile multiples so
    # the output is lane-dense and every store is a full vreg store.
    # Zero padding is exact: tanh(0)*sigmoid(0) == 0 and padded K columns of x
    # are zero, so padded rows/cols contribute nothing.
    w_hat_t = jnp.pad(w_hat.T, ((0, kp - in_dim), (0, np_ - out_dim)))
    m_hat_t = jnp.pad(m_hat.T, ((0, kp - in_dim), (0, np_ - out_dim)))
    x_p = jnp.pad(x, ((0, mp - batch), (0, kp - in_dim))).astype(compute_dtype)

    # Gate, hoisted: transcendentals run once per weight element, not per
    # batch tile; emitted in the MXU input dtype (bf16 by default).
    w_p = _nac_gate(w_hat_t, m_hat_t, tk=tk, tn=tn, compute_dtype=compute_dtype)

    # Tiled MXU matmul with f32 accumulation.
    y_p = _nac_matmul(x_p, w_p, tm=tm, tk=tk, tn=tn, out_dtype=out_dtype)
    return y_p[:batch, :out_dim]


def kaiming_uniform(key, shape):
    # Matches torch.nn.init.kaiming_uniform_ defaults (a=0, fan_in, gain=sqrt(2)):
    # bound = sqrt(6 / fan_in), fan_in = shape[1] for an (out, in) weight.
    fan_in = shape[1]
    bound = math.sqrt(6.0 / fan_in)
    return jax.random.uniform(key, shape, jnp.float32, -bound, bound)


def reference_forward(x, w_hat, m_hat):
    w = jnp.tanh(w_hat) * jax.nn.sigmoid(m_hat)
    return x @ w.T


if __name__ == "__main__":
    batch, in_dim, out_dim = 8, 32, 16

    key = jax.random.PRNGKey(0)
    k_x, k_w, k_m = jax.random.split(key, 3)

    x = jax.random.normal(k_x, (batch, in_dim), jnp.float32)
    w_hat = kaiming_uniform(k_w, (out_dim, in_dim))
    m_hat = kaiming_uniform(k_m, (out_dim, in_dim))

    y_ref = reference_forward(x, w_hat, m_hat)

    # Exact-precision path (f32 MXU inputs, f32 accumulation).
    y_f32 = jax.block_until_ready(
        nac_forward(x, w_hat, m_hat, compute_dtype=jnp.float32)
    )
    assert y_f32.shape == (batch, out_dim)
    assert jnp.allclose(y_f32, y_ref, atol=1e-5, rtol=1e-5)

    # Default fast path: bf16 MXU inputs with f32 accumulation.
    y_bf16 = jax.block_until_ready(nac_forward(x, w_hat, m_hat))
    assert y_bf16.shape == (batch, out_dim)
    assert jnp.allclose(y_bf16, y_ref, atol=5e-2, rtol=5e-2)

    print("KERNEL_OK")
</pallas_src>

<mosaic_0001>
module attributes {stable_mosaic.version = 11 : i64} {
  func.func @_nac_gate_kernel(%arg0: i32, %arg1: i32, %arg2: memref<128x128xf32, #tpu.memory_space<vmem>>, %arg3: memref<128x128xf32, #tpu.memory_space<vmem>>, %arg4: memref<128x128xf32, #tpu.memory_space<vmem>>) attributes {dimension_semantics = [#tpu.dimension_semantics<parallel>, #tpu.dimension_semantics<parallel>], iteration_bounds = array<i64: 1, 1>, scalar_prefetch = 0 : i64, scratch_operands = 0 : i64, tpu.core_type = #tpu.core_type<tc>, window_params = [{transform_indices = @transform_0, window_bounds = array<i64: 128, 128>}, {transform_indices = @transform_1, window_bounds = array<i64: 128, 128>}, {transform_indices = @transform_2, window_bounds = array<i64: 128, 128>}]} {
    %c0 = arith.constant 0 : index
    %c0_0 = arith.constant 0 : index
    %0 = vector.load %arg2[%c0, %c0_0] : memref<128x128xf32, #tpu.memory_space<vmem>>, vector<128x128xf32>
    %1 = math.tanh %0 : vector<128x128xf32>
    %c0_1 = arith.constant 0 : index
    %c0_2 = arith.constant 0 : index
    %2 = vector.load %arg3[%c0_1, %c0_2] : memref<128x128xf32, #tpu.memory_space<vmem>>, vector<128x128xf32>
    %3 = arith.negf %2 : vector<128x128xf32>
    %4 = math.exp %3 : vector<128x128xf32>
    %cst = arith.constant 1.000000e+00 : f32
    %5 = vector.broadcast %cst : f32 to vector<128x128xf32>
    %6 = arith.addf %5, %4 : vector<128x128xf32>
    %7 = arith.divf %5, %6 : vector<128x128xf32>
    %8 = arith.mulf %1, %7 : vector<128x128xf32>
    %c0_3 = arith.constant 0 : index
    %c0_4 = arith.constant 0 : index
    %9 = vector.load %arg4[%c0_3, %c0_4] : memref<128x128xf32, #tpu.memory_space<vmem>>, vector<128x128xf32>
    tpu.vector_store %arg4[%c0_3, %c0_4], %8 {strides = array<i32>} : memref<128x128xf32, #tpu.memory_space<vmem>>, vector<128x128xf32>,
    return
  }
  func.func @transform_0(%arg0: i32, %arg1: i32) -> (i32, i32) {
    %c0_i32 = arith.constant 0 : i32
    return %arg0, %arg1 : i32, i32
  }
  func.func @transform_1(%arg0: i32, %arg1: i32) -> (i32, i32) {
    %c0_i32 = arith.constant 0 : i32
    return %arg0, %arg1 : i32, i32
  }
  func.func @transform_2(%arg0: i32, %arg1: i32) -> (i32, i32) {
    %c0_i32 = arith.constant 0 : i32
    return %arg0, %arg1 : i32, i32
  }
}

</mosaic_0001>

<bundles_post_ra>
// kernel: tpu_custom_call.1
= control target key start
LH: loop header
LB: loop body
LE: loop exit
PB: predicated region body
PF: predicated region fallthrough
CT: control target
= control target key end

     0   :  { %7 = vsyncpa [#allocation3], 0  ;;  %s1000_s0 = inlined_call_operand.hbm [shape: f32[128,128], index: 0, kind: input, shape index: {}]   ;;  %s1001_s1 = inlined_call_operand.hbm [shape: f32[128,128], index: 1, kind: input, shape index: {}]   ;;  %s1002_s2 = inlined_call_operand.hbm [shape: f32[128,128], index: 2, kind: output, shape index: {}]  }
   0x1   :  { %8 = vsyncpa [#allocation6], 0 }
   0x2   :  { %9 = vsyncpa [#allocation4], 0  ;;  %s14_s11 = sshll.u32 %s1000_s0, 4  ;;  %s643_s12 = smov [#allocation2]   ;;  %s15_s11 = int_to_ptr.hbm [resolvable:$true] %s14_s11 }
   0x3   :  { %s16_s13 = sshll.u32 %s643_s12, 4  ;;  %s27_s16 = sshll.u32 %s1001_s1, 4  ;;  %s17_s13 = int_to_ptr.vmem [resolvable:$true] %s16_s13  ;;  %s28_s16 = int_to_ptr.hbm [resolvable:$true] %s27_s16 }
   0x4   :  { %s644_s17 = smov 128   ;;  %s645_s18 = smov 8  }
   0x5   :  { %22 = dma.hbm_to_vmem [thread:$0]  %s15_s11, 2048, %s17_s13, [#allocation3], %s644_s17, %s644_s17, %s645_s18  }
   0x6   :  { %s646_s19 = smov [#allocation5]  }
   0x7   :  { %s29_s20 = sshll.u32 %s646_s19, 4  ;;  %s30_s20 = int_to_ptr.vmem [resolvable:$true] %s29_s20 }
   0x8   :  { %35 = dma.hbm_to_vmem [thread:$0]  %s28_s16, 2048, %s30_s20, [#allocation6], %s644_s17, %s644_s17, %s645_s18  }
   0x9   :  { %637 = dma.done.wait [#allocation3], 2048  }
   0xa   :  { %638 = vsyncadd [#allocation3], 4294965248 }
   0xb   :  { %639 = dma.done.wait [#allocation6], 2048  }
   0xc   :  { %640 = vsyncadd [#allocation6], 4294965248  ;;  %v44_v0 = vld [vmem:[#allocation2] sm:$0xff]  ;;  %v77_v3 = vld [vmem:[#allocation5 + $0x8] sm:$0xff]  ;;  %s647_s0 = smov [#allocation7]   ;;  %s434_s23 = sshll.u32 %s1002_s2, 4  ;;  %s435_s23 = int_to_ptr.hbm [resolvable:$true] %s434_s23 }
   0xd   :  { %v76_v1 = vld [vmem:[#allocation5] sm:$0xff]  ;;  %v78_v4 = vld [vmem:[#allocation5 + $0x10] sm:$0xff]  ;;  %469 = vtanh.f32 %v44_v0  ;;  %v45_v5 = vld [vmem:[#allocation2 + $0x8] sm:$0xff]  ;;  %v449_v6 = vmul.f32 -1.442695, %v77_v3  ;;  %s432_s1 = sshll.u32 %s647_s0, 4  ;;  %s433_s1 = int_to_ptr.vmem [resolvable:$true] %s432_s1 }
   0xe   :  { %v448_v2 = vmul.f32 -1.442695, %v76_v1  ;;  %v450_v7 = vmul.f32 -1.442695, %v78_v4  ;;  %v79_v8 = vld [vmem:[#allocation5 + $0x18] sm:$0xff]  ;;  %v80_v9 = vld [vmem:[#allocation5 + $0x20] sm:$0xff] }
   0xf   :  { %v46_v10 = vld [vmem:[#allocation2 + $0x10] sm:$0xff]  ;;  %v451_v11 = vmul.f32 -1.442695, %v79_v8  ;;  %v47_v12 = vld [vmem:[#allocation2 + $0x18] sm:$0xff]  ;;  %v452_v13 = vmul.f32 -1.442695, %v80_v9 }
  0x10   :  { %471 = vpow2.f32 %v448_v2  ;;  %v81_v14 = vld [vmem:[#allocation5 + $0x28] sm:$0xff]  ;;  %v48_v16 = vld [vmem:[#allocation2 + $0x20] sm:$0xff]  ;;  %v82_v23 = vld [vmem:[#allocation5 + $0x30] sm:$0xff] }
  0x11   :  { %473 = vpow2.f32 %v449_v6  ;;  %v453_v20 = vmul.f32 -1.442695, %v81_v14  ;;  %v49_v25 = vld [vmem:[#allocation2 + $0x28] sm:$0xff]  ;;  %v83_v26 = vld [vmem:[#allocation5 + $0x38] sm:$0xff]  ;;  %v84_v30 = vld [vmem:[#allocation5 + $0x40] sm:$0xff] }
  0x12   :  { %475 = vtanh.f32 %v45_v5  ;;  %v85_v31 = vld [vmem:[#allocation5 + $0x48] sm:$0xff]  ;;  %v454_v35 = vmul.f32 -1.442695, %v82_v23  ;;  %v697_v39 = vmul.f32 -1.442695, %v83_v26  ;;  %v52_v4 = vld [vmem:[#allocation2 + $0x40] sm:$0xff] }
  0x13   :  { %477 = vpow2.f32 %v450_v7  ;;  %v675_v15 = vpop.eup %469  ;;  %v701_v41 = vmul.f32 -1.442695, %v84_v30  ;;  %v703_v42 = vmul.f32 -1.442695, %v85_v31  ;;  %v53_v6 = vld [vmem:[#allocation2 + $0x48] sm:$0xff] }
  0x14   :  { %479 = vtanh.f32 %v46_v10 }
  0x15   :  { %481 = vpow2.f32 %v451_v11 }
  0x16   :  { %v472_v17 = vpop.eup %471  ;;  %483 = vtanh.f32 %v47_v12 }
  0x17   :  { %v474_v18 = vpop.eup %473  ;;  %v677_v19 = vadd.f32 1.0, %v472_v17  ;;  %485 = vpow2.f32 %v452_v13 }
  0x18   :  { %v679_v21 = vpop.eup %475  ;;  %v681_v22 = vadd.f32 1.0, %v474_v18  ;;  %487 = vtanh.f32 %v48_v16 }
  0x19   :  { %v478_v24 = vpop.eup %477  ;;  %489 = vrcp.f32 %v677_v19  ;;  %v165_v28 = vand.u32 2147483647, %v677_v19  ;;  %v167_v29 = vand.u32 2147483648, %v677_v19  ;;  %vm161_vm0 = vweird.f32 %v677_v19 }
  0x1a   :  { %v684_v27 = vpop.eup %479  ;;  %491 = vrcp.f32 %v681_v22  ;;  %v180_v33 = vand.u32 2147483647, %v681_v22  ;;  %v690_v34 = vadd.f32 1.0, %v478_v24  ;;  %v182_v37 = vand.u32 2147483648, %v681_v22 }
  0x1b   :  { %v482_v32 = vpop.eup %481  ;;  %493 = vpow2.f32 %v453_v20  ;;  %vm707_vm1 = vcmp.eq.f32.partialorder %v165_v28, 8.507059e+37  ;;  %v168_v45 = vor.u32 1.1754944e-38, %v167_v29  ;;  %vm176_vm2 = vweird.f32 %v681_v22 }
  0x1c   :  { %v692_v36 = vpop.eup %483  ;;  %v695_v38 = vadd.f32 1.0, %v482_v32  ;;  %495 = vtanh.f32 %v49_v25  ;;  %vm713_vm3 = vcmp.eq.f32.partialorder %v180_v33, 8.507059e+37  ;;  %v195_v48 = vand.u32 2147483647, %v690_v34 }
  0x1d   :  { %v486_v40 = vpop.eup %485  ;;  %497 = vrcp.f32 %v690_v34  ;;  %v197_v49 = vand.u32 2147483648, %v690_v34  ;;  %v183_v53 = vor.u32 1.1754944e-38, %v182_v37  ;;  %vm191_vm4 = vweird.f32 %v690_v34 }
  0x1e   :  { %v705_v43 = vpop.eup %487  ;;  %499 = vrcp.f32 %v695_v38  ;;  %v719_v50 = vadd.f32 1.0, %v486_v40  ;;  %v210_v54 = vand.u32 2147483647, %v695_v38  ;;  %vm206_vm5 = vweird.f32 %v695_v38 }
  0x1f   :  { %v490_v46 = vpop.eup %489  ;;  %v212_v57 = vand.u32 2147483648, %v695_v38  ;;  %vm732_vm8 = vcmp.eq.f32.partialorder %v195_v48, 8.507059e+37  ;;  %v198_v0 = vor.u32 1.1754944e-38, %v197_v49 }
  0x20   :  { %v492_v51 = vpop.eup %491  ;;  %v157_v52 = vmul.f32 %v490_v46, %v677_v19  ;;  %501 = vrcp.f32 %v719_v50  ;;  %vm162_vm6 = vweird.f32 %v490_v46  ;;  %vm737_vm9 = vcmp.eq.f32.partialorder %v210_v54, 8.507059e+37  ;;  %v50_v54 = vld [vmem:[#allocation2 + $0x30] sm:$0xff] }
  0x21   :  { %v494_v55 = vpop.eup %493  ;;  %v172_v56 = vmul.f32 %v492_v51, %v681_v22  ;;  %503 = vpow2.f32 %v454_v35  ;;  %vm177_vm7 = vweird.f32 %v492_v51  ;;  %v225_v5 = vand.u32 2147483647, %v719_v50  ;;  %vm744_vm10 = vmor %vm161_vm0, %vm162_vm6 }
  0x22   :  { %v728_v58 = vpop.eup %495  ;;  %v158_v59 = vsub.f32 1.0, %v157_v52  ;;  %v730_v60 = vadd.f32 1.0, %v494_v55  ;;  %v213_v9 = vor.u32 1.1754944e-38, %v212_v57  ;;  %vm221_vm11 = vweird.f32 %v719_v50  ;;  %vm752_vm12 = vmor %vm176_vm2, %vm177_vm7  ;;  %v86_v55 = vld [vmem:[#allocation5 + $0x50] sm:$0xff] }
  0x23   :  { %v498_v61 = vpop.eup %497  ;;  %v173_v62 = vsub.f32 1.0, %v172_v56  ;;  %v227_v17 = vand.u32 2147483648, %v719_v50  ;;  %vm761_vm15 = vcmp.eq.f32.partialorder %v225_v5, 8.507059e+37 }
  0x24   :  { %v500_v1 = vpop.eup %499  ;;  %v159_v2 = vmul.f32 %v490_v46, %v158_v59  ;;  %v187_v3 = vmul.f32 %v498_v61, %v690_v34  ;;  %vm192_vm13 = vweird.f32 %v498_v61  ;;  %505 = vrcp.f32 %v730_v60  ;;  %v51_v59 = vld [vmem:[#allocation2 + $0x38] sm:$0xff] }
  0x25   :  { %v174_v7 = vmul.f32 %v492_v51, %v173_v62  ;;  %v202_v8 = vmul.f32 %v500_v1, %v695_v38  ;;  %vm207_vm14 = vweird.f32 %v500_v1  ;;  %vm771_vm0 = vmor %vm191_vm4, %vm192_vm13  ;;  %v228_v37 = vor.u32 1.1754944e-38, %v227_v17  ;;  %v54_v17 = vld [vmem:[#allocation2 + $0x50] sm:$0xff] }
  0x26   :  { %v160_v10 = vadd.f32 %v490_v46, %v159_v2  ;;  %v188_v12 = vsub.f32 1.0, %v187_v3  ;;  %v502_v13 = vpop.eup %501  ;;  %507 = vpow2.f32 %v697_v39  ;;  %v242_v48 = vand.u32 2147483648, %v730_v60 }
  0x27   :  { %v175_v14 = vadd.f32 %v492_v51, %v174_v7  ;;  %v203_v16 = vsub.f32 1.0, %v202_v8  ;;  %v504_v18 = vpop.eup %503  ;;  %v217_v22 = vmul.f32 %v502_v13, %v719_v50  ;;  %vm222_vm2 = vweird.f32 %v502_v13 }
  0x28   :  { %v164_v19 = vsel %vm744_vm10, %v490_v46, %v160_v10  ;;  %v189_v20 = vmul.f32 %v498_v61, %v188_v12  ;;  %v786_v40 = vadd.f32 1.0, %v504_v18  ;;  %vm799_vm4 = vmor %vm221_vm11, %vm222_vm2  ;;  %v240_v50 = vand.u32 2147483647, %v730_v60  ;;  %v88_v12 = vld [vmem:[#allocation5 + $0x60] sm:$0xff] }
  0x29   :  { %v169_v24 = vsel %vm707_vm1, %v168_v45, %v164_v19  ;;  %v179_v25 = vsel %vm752_vm12, %v492_v51, %v175_v14  ;;  %v204_v28 = vmul.f32 %v500_v1, %v203_v16  ;;  %vm781_vm1 = vmor %vm206_vm5, %vm207_vm14  ;;  %v218_v33 = vsub.f32 1.0, %v217_v22 }
  0x2a   :  { %v396_v29 = vmul.f32 %v675_v15, %v169_v24  ;;  %v184_v30 = vsel %vm713_vm3, %v183_v53, %v179_v25  ;;  %v190_v31 = vadd.f32 %v498_v61, %v189_v20  ;;  %v506_v44 = vpop.eup %505  ;;  %vm236_vm3 = vweird.f32 %v730_v60  ;;  %v55_v20 = vld [vmem:[#allocation2 + $0x58] sm:$0xff] }
  0x2b   :  { %v397_v34 = vmul.f32 %v679_v21, %v184_v30  ;;  %v205_v35 = vadd.f32 %v500_v1, %v204_v28  ;;  %v219_v45 = vmul.f32 %v502_v13, %v218_v33  ;;  %v232_v47 = vmul.f32 %v506_v44, %v730_v60 }
  0x2c   :  { %412 = vst [vmem:[#allocation7] sm:$0xff] %v396_v29  ;;  %v194_v15 = vsel %vm771_vm0, %v498_v61, %v190_v31  ;;  %509 = vrcp.f32 %v786_v40  ;;  %vm237_vm5 = vweird.f32 %v506_v44  ;;  %v87_v61 = vld [vmem:[#allocation5 + $0x58] sm:$0xff]  ;;  %vm241_vm7 = vcmp.eq.f32.partialorder %v240_v50, 8.507059e+37 }
  0x2d   :  { %413 = vst [vmem:[#allocation7 + $0x8] sm:$0xff] %v397_v34  ;;  %v199_v38 = vsel %vm732_vm8, %v198_v0, %v194_v15  ;;  %v209_v21 = vsel %vm781_vm1, %v500_v1, %v205_v35  ;;  %v220_v51 = vadd.f32 %v502_v13, %v219_v45  ;;  %v233_v53 = vsub.f32 1.0, %v232_v47  ;;  %vm819_vm6 = vmor %vm236_vm3, %vm237_vm5  ;;  %v90_v35 = vld [vmem:[#allocation5 + $0x70] sm:$0xff]  ;;  %v56_v47 = vld [vmem:[#allocation2 + $0x60] sm:$0xff] }
  0x2e   :  { %v398_v39 = vmul.f32 %v684_v27, %v199_v38  ;;  %v214_v49 = vsel %vm737_vm9, %v213_v9, %v209_v21  ;;  %511 = vpow2.f32 %v701_v41  ;;  %v243_v0 = vor.u32 1.1754944e-38, %v242_v48 }
  0x2f   :  { %v399_v52 = vmul.f32 %v692_v36, %v214_v49  ;;  %v224_v56 = vsel %vm799_vm4, %v502_v13, %v220_v51  ;;  %v234_v57 = vmul.f32 %v506_v44, %v233_v53  ;;  %v508_v36 = vpop.eup %507  ;;  %513 = vtanh.f32 %v50_v54  ;;  %v89_v13 = vld [vmem:[#allocation5 + $0x68] sm:$0xff] }
  0x30   :  { %414 = vst [vmem:[#allocation7 + $0x10] sm:$0xff] %v398_v39  ;;  %v229_v27 = vsel %vm761_vm15, %v228_v37, %v224_v56  ;;  %v458_v1 = vmul.f32 -1.442695, %v86_v55  ;;  %v823_v3 = vadd.f32 1.0, %v508_v36  ;;  %515 = vpow2.f32 %v703_v42  ;;  %v91_v37 = vld [vmem:[#allocation5 + $0x78] sm:$0xff] }
  0x31   :  { %415 = vst [vmem:[#allocation7 + $0x18] sm:$0xff] %v399_v52  ;;  %v400_v62 = vmul.f32 %v705_v43, %v229_v27  ;;  %v235_v2 = vadd.f32 %v506_v44, %v234_v57  ;;  %517 = vtanh.f32 %v51_v59  ;;  %v459_v43 = vmul.f32 -1.442695, %v87_v61 }
  0x32   :  { %v510_v41 = vpop.eup %509  ;;  %vm251_vm8 = vweird.f32 %v786_v40  ;;  %519 = vrcp.f32 %v823_v3  ;;  %v255_v8 = vand.u32 2147483647, %v786_v40  ;;  %v257_v9 = vand.u32 2147483648, %v786_v40 }
  0x33   :  { %416 = vst [vmem:[#allocation7 + $0x20] sm:$0xff] %v400_v62  ;;  %v239_v60 = vsel %vm819_vm6, %v506_v44, %v235_v2  ;;  %v247_v5 = vmul.f32 %v510_v41, %v786_v40  ;;  %521 = vtanh.f32 %v52_v4  ;;  %vm252_vm9 = vweird.f32 %v510_v41 }
  0x34   :  { %v244_v7 = vsel %vm241_vm7, %v243_v0, %v239_v60  ;;  %v512_v42 = vpop.eup %511  ;;  %523 = vpow2.f32 %v458_v1  ;;  %vm840_vm10 = vmor %vm251_vm8, %vm252_vm9  ;;  %v258_v23 = vor.u32 1.1754944e-38, %v257_v9  ;;  %v460_v24 = vmul.f32 -1.442695, %v88_v12 }
  0x35   :  { %v401_v10 = vmul.f32 %v728_v58, %v244_v7  ;;  %v248_v11 = vsub.f32 1.0, %v247_v5  ;;  %v514_v14 = vpop.eup %513  ;;  %v834_v16 = vadd.f32 1.0, %v512_v42  ;;  %525 = vtanh.f32 %v53_v6 }
  0x36   :  { %v516_v18 = vpop.eup %515  ;;  %527 = vpow2.f32 %v459_v43  ;;  %v461_v25 = vmul.f32 -1.442695, %v89_v13  ;;  %vm845_vm11 = vcmp.eq.f32.partialorder %v255_v8, 8.507059e+37  ;;  %v270_v33 = vand.u32 2147483647, %v823_v3 }
  0x37   :  { %417 = vst [vmem:[#allocation7 + $0x28] sm:$0xff] %v401_v10  ;;  %v249_v19 = vmul.f32 %v510_v41, %v248_v11  ;;  %v836_v22 = vpop.eup %517  ;;  %529 = vrcp.f32 %v834_v16  ;;  %v849_v30 = vadd.f32 1.0, %v516_v18  ;;  %v272_v34 = vand.u32 2147483648, %v823_v3 }
  0x38   :  { %v520_v26 = vpop.eup %519  ;;  %531 = vtanh.f32 %v54_v17  ;;  %vm266_vm12 = vweird.f32 %v823_v3  ;;  %v287_v15 = vand.u32 2147483648, %v834_v16  ;;  %v867_v49 = vmul.f32 -1.442695, %v90_v35 }
  0x39   :  { %v250_v28 = vadd.f32 %v510_v41, %v249_v19  ;;  %v851_v31 = vpop.eup %521  ;;  %v262_v32 = vmul.f32 %v520_v26, %v823_v3  ;;  %533 = vtanh.f32 %v55_v20  ;;  %vm267_vm13 = vweird.f32 %v520_v26  ;;  %v59_v20 = vld [vmem:[#allocation2 + $0x78] sm:$0xff] }
  0x3a   :  { %v524_v40 = vpop.eup %523  ;;  %535 = vrcp.f32 %v849_v30  ;;  %v869_v51 = vmul.f32 -1.442695, %v91_v37  ;;  %vm871_vm14 = vcmp.eq.f32.partialorder %v270_v33, 8.507059e+37  ;;  %v273_v54 = vor.u32 1.1754944e-38, %v272_v34  ;;  %vm881_vm15 = vmor %vm266_vm12, %vm267_vm13 }
  0x3b   :  { %v254_v44 = vsel %vm840_vm10, %v510_v41, %v250_v28  ;;  %v861_v45 = vpop.eup %525  ;;  %v263_v21 = vsub.f32 1.0, %v262_v32  ;;  %v865_v46 = vadd.f32 1.0, %v524_v40  ;;  %537 = vpow2.f32 %v460_v24 }
  0x3c   :  { %v259_v38 = vsel %vm845_vm11, %v258_v23, %v254_v44  ;;  %v528_v48 = vpop.eup %527  ;;  %vm281_vm0 = vweird.f32 %v834_v16  ;;  %v285_v57 = vand.u32 2147483647, %v834_v16  ;;  %v288_v36 = vor.u32 1.1754944e-38, %v287_v15 }
  0x3d   :  { %v402_v39 = vmul.f32 %v514_v14, %v259_v38  ;;  %v530_v52 = vpop.eup %529  ;;  %v264_v53 = vmul.f32 %v520_v26, %v263_v21  ;;  %539 = vrcp.f32 %v865_v46  ;;  %vm296_vm2 = vweird.f32 %v849_v30 }
  0x3e   :  { %v876_v55 = vpop.eup %531  ;;  %v277_v27 = vmul.f32 %v530_v52, %v834_v16  ;;  %541 = vtanh.f32 %v56_v47  ;;  %v891_v62 = vadd.f32 1.0, %v528_v48  ;;  %vm282_vm1 = vweird.f32 %v530_v52 }
  0x3f   :  { %418 = vst [vmem:[#allocation7 + $0x30] sm:$0xff] %v402_v39  ;;  %v888_v59 = vpop.eup %533  ;;  %v265_v61 = vadd.f32 %v520_v26, %v264_v53  ;;  %v300_v1 = vand.u32 2147483647, %v849_v30  ;;  %543 = vpow2.f32 %v461_v25  ;;  %v302_v4 = vand.u32 2147483648, %v849_v30  ;;  %vm906_vm3 = vmor %vm281_vm0, %vm282_vm1  ;;  %v57_v53 = vld [vmem:[#allocation2 + $0x68] sm:$0xff] }
  0x40   :  { %v536_v63 = vpop.eup %535  ;;  %v278_v0 = vsub.f32 1.0, %v277_v27  ;;  %545 = vrcp.f32 %v891_v62  ;;  %v315_v5 = vand.u32 2147483647, %v865_v46  ;;  %v317_v6 = vand.u32 2147483648, %v865_v46 }
  0x41   :  { %v269_v2 = vsel %vm881_vm15, %v520_v26, %v265_v61  ;;  %v292_v3 = vmul.f32 %v536_v63, %v849_v30  ;;  %v538_v41 = vpop.eup %537  ;;  %vm297_vm4 = vweird.f32 %v536_v63  ;;  %vm286_vm5 = vcmp.eq.f32.partialorder %v285_v57, 8.507059e+37 }
  0x42   :  { %v274_v43 = vsel %vm871_vm14, %v273_v54, %v269_v2  ;;  %v279_v60 = vmul.f32 %v530_v52, %v278_v0  ;;  %v910_v10 = vadd.f32 1.0, %v538_v41  ;;  %vm914_vm6 = vcmp.eq.f32.partialorder %v300_v1, 8.507059e+37  ;;  %vm925_vm8 = vmor %vm296_vm2, %vm297_vm4 }
  0x43   :  { %v540_v7 = vpop.eup %539  ;;  %v403_v8 = vmul.f32 %v836_v22, %v274_v43  ;;  %v293_v42 = vsub.f32 1.0, %v292_v3  ;;  %v303_v17 = vor.u32 1.1754944e-38, %v302_v4  ;;  %vm311_vm7 = vweird.f32 %v865_v46 }
  0x44   :  { %v912_v11 = vpop.eup %541  ;;  %v280_v12 = vadd.f32 %v530_v52, %v279_v60  ;;  %v307_v14 = vmul.f32 %v540_v7, %v865_v46  ;;  %547 = vrcp.f32 %v910_v10  ;;  %vm312_vm9 = vweird.f32 %v540_v7 }
  0x45   :  { %419 = vst [vmem:[#allocation7 + $0x38] sm:$0xff] %v403_v8  ;;  %v294_v16 = vmul.f32 %v536_v63, %v293_v42  ;;  %v544_v18 = vpop.eup %543  ;;  %vm929_vm10 = vcmp.eq.f32.partialorder %v315_v5, 8.507059e+37  ;;  %v318_v26 = vor.u32 1.1754944e-38, %v317_v6  ;;  %v330_v33 = vand.u32 2147483647, %v891_v62  ;;  %vm942_vm11 = vmor %vm311_vm7, %vm312_vm9 }
  0x46   :  { %v284_v19 = vsel %vm906_vm3, %v530_v52, %v280_v12  ;;  %v308_v22 = vsub.f32 1.0, %v307_v14  ;;  %v546_v23 = vpop.eup %545  ;;  %v933_v28 = vadd.f32 1.0, %v544_v18  ;;  %vm326_vm12 = vweird.f32 %v891_v62  ;;  %v58_v14 = vld [vmem:[#allocation2 + $0x70] sm:$0xff] }
  0x47   :  { %v289_v24 = vsel %vm286_vm5, %v288_v36, %v284_v19  ;;  %v295_v25 = vadd.f32 %v536_v63, %v294_v16  ;;  %v322_v30 = vmul.f32 %v546_v23, %v891_v62  ;;  %v332_v37 = vand.u32 2147483648, %v891_v62 }
  0x48   :  { %v404_v29 = vmul.f32 %v851_v31, %v289_v24  ;;  %v309_v32 = vmul.f32 %v540_v7, %v308_v22  ;;  %549 = vrcp.f32 %v933_v28  ;;  %vm327_vm13 = vweird.f32 %v546_v23 }
  0x49   :  { %v299_v34 = vsel %vm925_vm8, %v536_v63, %v295_v25  ;;  %v323_v44 = vsub.f32 1.0, %v322_v30  ;;  %v345_v21 = vand.u32 2147483647, %v910_v10  ;;  %v347_v46 = vand.u32 2147483648, %v910_v10  ;;  %vm966_vm15 = vmor %vm326_vm12, %vm327_vm13 }
  0x4a   :  { %420 = vst [vmem:[#allocation7 + $0x40] sm:$0xff] %v404_v29  ;;  %v304_v31 = vsel %vm914_vm6, %v303_v17, %v299_v34  ;;  %v310_v40 = vadd.f32 %v540_v7, %v309_v32  ;;  %v548_v15 = vpop.eup %547  ;;  %551 = vpow2.f32 %v867_v49  ;;  %vm957_vm14 = vcmp.eq.f32.partialorder %v330_v33, 8.507059e+37 }
  0x4b   :  { %v405_v38 = vmul.f32 %v861_v45, %v304_v31  ;;  %v324_v48 = vmul.f32 %v546_v23, %v323_v44  ;;  %v337_v52 = vmul.f32 %v548_v15, %v910_v10  ;;  %v333_v49 = vor.u32 1.1754944e-38, %v332_v37 }
  0x4c   :  { %v314_v47 = vsel %vm942_vm11, %v540_v7, %v310_v40  ;;  %vm341_vm0 = vweird.f32 %v910_v10  ;;  %vm342_vm2 = vweird.f32 %v548_v15  ;;  %553 = vpow2.f32 %v869_v51 }
  0x4d   :  { %421 = vst [vmem:[#allocation7 + $0x48] sm:$0xff] %v405_v38  ;;  %v319_v45 = vsel %vm929_vm10, %v318_v26, %v314_v47  ;;  %v325_v56 = vadd.f32 %v546_v23, %v324_v48  ;;  %v338_v27 = vsub.f32 1.0, %v337_v52  ;;  %vm973_vm1 = vcmp.eq.f32.partialorder %v345_v21, 8.507059e+37  ;;  %vm343_vm4 = vmor %vm341_vm0, %vm342_vm2 }
  0x4e   :  { %v406_v54 = vmul.f32 %v876_v55, %v319_v45  ;;  %v550_v57 = vpop.eup %549  ;;  %v348_v36 = vor.u32 1.1754944e-38, %v347_v46  ;;  %555 = vtanh.f32 %v57_v53  ;;  %vm356_vm3 = vweird.f32 %v933_v28 }
  0x4f   :  { %v329_v62 = vsel %vm966_vm15, %v546_v23, %v325_v56  ;;  %v339_v63 = vmul.f32 %v548_v15, %v338_v27  ;;  %v352_v0 = vmul.f32 %v550_v57, %v933_v28  ;;  %vm357_vm5 = vweird.f32 %v550_v57 }
  0x50   :  { %422 = vst [vmem:[#allocation7 + $0x50] sm:$0xff] %v406_v54  ;;  %v552_v55 = vpop.eup %551  ;;  %v334_v51 = vsel %vm957_vm14, %v333_v49, %v329_v62  ;;  %v360_v1 = vand.u32 2147483647, %v933_v28  ;;  %v362_v2 = vand.u32 2147483648, %v933_v28  ;;  %vm358_vm6 = vmor %vm356_vm3, %vm357_vm5 }
  0x51   :  { %v407_v3 = vmul.f32 %v888_v59, %v334_v51  ;;  %v340_v4 = vadd.f32 %v548_v15, %v339_v63  ;;  %v353_v41 = vsub.f32 1.0, %v352_v0  ;;  %v154_v43 = vadd.f32 1.0, %v552_v55 }
  0x52   :  { %v554_v60 = vpop.eup %553  ;;  %v363_v9 = vor.u32 1.1754944e-38, %v362_v2  ;;  %vm361_vm7 = vcmp.eq.f32.partialorder %v360_v1, 8.507059e+37 }
  0x53   :  { %423 = vst [vmem:[#allocation7 + $0x58] sm:$0xff] %v407_v3  ;;  %v344_v5 = vsel %vm343_vm4, %v548_v15, %v340_v4  ;;  %v354_v6 = vmul.f32 %v550_v57, %v353_v41  ;;  %557 = vrcp.f32 %v154_v43  ;;  %v155_v42 = vadd.f32 1.0, %v554_v60 }
  0x54   :  { %v556_v7 = vpop.eup %555  ;;  %v349_v8 = vsel %vm973_vm1, %v348_v36, %v344_v5  ;;  %v377_v19 = vand.u32 2147483648, %v154_v43  ;;  %vm371_vm8 = vweird.f32 %v154_v43  ;;  %v375_v23 = vand.u32 2147483647, %v154_v43 }
  0x55   :  { %v408_v10 = vmul.f32 %v912_v11, %v349_v8  ;;  %v355_v59 = vadd.f32 %v550_v57, %v354_v6  ;;  %559 = vrcp.f32 %v155_v42  ;;  %v392_v26 = vand.u32 2147483648, %v155_v42 }
  0x56   :  { %561 = vtanh.f32 %v58_v14  ;;  %v378_v25 = vor.u32 1.1754944e-38, %v377_v19  ;;  %vm386_vm11 = vweird.f32 %v155_v42  ;;  %v390_v29 = vand.u32 2147483647, %v155_v42 }
  0x57   :  { %424 = vst [vmem:[#allocation7 + $0x60] sm:$0xff] %v408_v10  ;;  %v359_v12 = vsel %vm358_vm6, %v550_v57, %v355_v59  ;;  %563 = vtanh.f32 %v59_v20  ;;  %vm376_vm13 = vcmp.eq.f32.partialorder %v375_v23, 8.507059e+37  ;;  %v393_v35 = vor.u32 1.1754944e-38, %v392_v26 }
  0x58   :  { %v364_v13 = vsel %vm361_vm7, %v363_v9, %v359_v12  ;;  %vm391_vm15 = vcmp.eq.f32.partialorder %v390_v29, 8.507059e+37 }
  0x59   :  { %v558_v16 = vpop.eup %557  ;;  %v409_v17 = vmul.f32 %v556_v7, %v364_v13 }
  0x5a   :  { %v367_v18 = vmul.f32 %v558_v16, %v154_v43  ;;  %vm372_vm9 = vweird.f32 %v558_v16 }
  0x5b   :  { %425 = vst [vmem:[#allocation7 + $0x68] sm:$0xff] %v409_v17  ;;  %v560_v22 = vpop.eup %559  ;;  %vm373_vm10 = vmor %vm371_vm8, %vm372_vm9 }
  0x5c   :  { %v368_v58 = vsub.f32 1.0, %v367_v18  ;;  %v382_v11 = vmul.f32 %v560_v22, %v155_v42  ;;  %vm387_vm12 = vweird.f32 %v560_v22  ;;  %v562_v30 = vpop.eup %561 }
  0x5d   :  { %vm388_vm14 = vmor %vm386_vm11, %vm387_vm12  ;;  %v564_v40 = vpop.eup %563 }
  0x5e   :  { %v369_v24 = vmul.f32 %v558_v16, %v368_v58  ;;  %v383_v28 = vsub.f32 1.0, %v382_v11 }
  0x60   :  { %v370_v32 = vadd.f32 %v558_v16, %v369_v24  ;;  %v384_v33 = vmul.f32 %v560_v22, %v383_v28 }
  0x62   :  { %v374_v34 = vsel %vm373_vm10, %v558_v16, %v370_v32  ;;  %v385_v31 = vadd.f32 %v560_v22, %v384_v33 }
  0x63   :  { %v379_v37 = vsel %vm376_vm13, %v378_v25, %v374_v34 }
  0x64   :  { %v410_v44 = vmul.f32 %v562_v30, %v379_v37  ;;  %v389_v15 = vsel %vm388_vm14, %v560_v22, %v385_v31 }
  0x65   :  { %v394_v38 = vsel %vm391_vm15, %v393_v35, %v389_v15 }
  0x66   :  { %426 = vst [vmem:[#allocation7 + $0x70] sm:$0xff] %v410_v44  ;;  %v411_v21 = vmul.f32 %v564_v40, %v394_v38 }
  0x68   :  { %427 = vst [vmem:[#allocation7 + $0x78] sm:$0xff] %v411_v21 }
  0x69   :  { %440 = dma.vmem_to_hbm [thread:$0]  %s433_s1, 2048, %s435_s23, [#allocation4], %s644_s17, %s644_s17, %s645_s18  }
  0x6a   :  { %641 = dma.done.wait [#allocation4], 2048  }
  0x6b   :  { %642 = vsyncadd [#allocation4], 4294965248 }
  0x6c   :  { %445 = vsyncpa [#allocation3], 1 }
  0x6d   :  { %446 = vsyncpa [#allocation6], 1 }
  0x6e   :  { %447 = vsyncpa [#allocation4], 1 }

</bundles_post_ra>
